<compile_context>
chip_gen: v7x
topology: tpu7x:2x2x1
jax: 0.10.0
libtpu: 0.0.40
codegen_flags: <defaults>
</compile_context>

<pallas_src>
import functools

import jax
import jax.numpy as jnp
from jax.experimental import pallas as pl
from jax.experimental.pallas import tpu as pltpu

# "Environment" constants (CartPole-like): obs dim 4, 2 discrete actions.
N_STATES = 4
N_ACTIONS = 2
H1 = 24
H2 = 48

K1_PAD = 8          # input features 4 -> 8 sublanes (zero-padded)
OUT_ROWS_PAD = 8    # output features 2 -> 8 sublanes (zero-padded)
LANE = 128          # batch tile on the lane axis
MAX_BATCH_TILES = 16  # 16 * 128 = 2048 rows per grid step


def _round_up(x, m):
    return (x + m - 1) // m * m


def _mlp_kernel(xt_ref, w1_ref, b1_ref, w2_ref, b2_ref, w3_ref, b3_ref, ot_ref):
    # Transposed layout: batch on lanes, features on sublanes.
    # Layer 1 (f32 operands, K=8): (24, 8) @ (8, bm) -> (24, bm)
    h1 = jnp.tanh(
        jnp.dot(w1_ref[...], xt_ref[...], preferred_element_type=jnp.float32)
        + b1_ref[...]
    )
    cdt = w2_ref.dtype  # bf16 by default (v6e/v7x MXU), f32 accumulation
    # Layer 2: (48, 24) @ (24, bm) -> (48, bm)
    h2 = jnp.tanh(
        jnp.dot(w2_ref[...], h1.astype(cdt), preferred_element_type=jnp.float32)
        + b2_ref[...]
    )
    # Output layer: (8, 48) @ (48, bm) -> (8, bm); rows >= N_ACTIONS are zero.
    ot_ref[...] = (
        jnp.dot(w3_ref[...], h2.astype(cdt), preferred_element_type=jnp.float32)
        + b3_ref[...]
    ).astype(ot_ref.dtype)


@jax.jit
def net_forward(x, padded_params):
    """x: (B, N_STATES) f32 -> (B, N_ACTIONS) f32.

    `padded_params` must come from `pad_params(init_params(...))`.
    """
    w1t, b1t, w2t, b2t, w3t, b3t = padded_params
    B = x.shape[0]

    # Batch is on the lane axis -> tiles of 128 rows. Cap a block at 2048 rows
    # and, whenever there are >=2 lane tiles, use >=2 grid steps so the
    # ("parallel",) axis can shard across both v7x TensorCores.
    n_tiles = _round_up(B, LANE) // LANE
    if n_tiles <= 1:
        tiles_per_block = 1
    else:
        tiles_per_block = min(MAX_BATCH_TILES, pl.cdiv(n_tiles, 2))
    block_m = tiles_per_block * LANE
    b_pad = _round_up(B, block_m)
    grid = (b_pad // block_m,)

    # Transposed, zero-padded input (layer 1 stays f32). Padded rows/lanes are
    # zero; tanh(0)=0 and padded weight rows are zero, so results are exact.
    xt = jnp.zeros((K1_PAD, b_pad), jnp.float32).at[:N_STATES, :B].set(x.T)

    flops = 2 * b_pad * (H1 * K1_PAD + H2 * H1 + OUT_ROWS_PAD * H2)
    transcendentals = b_pad * (H1 + H2)
    bytes_accessed = (
        xt.size * xt.dtype.itemsize
        + sum(a.size * a.dtype.itemsize for a in (w1t, b1t, w2t, b2t, w3t, b3t))
        + OUT_ROWS_PAD * b_pad * 4
    )

    out_t = pl.pallas_call(
        _mlp_kernel,
        out_shape=jax.ShapeDtypeStruct((OUT_ROWS_PAD, b_pad), jnp.float32),
        grid=grid,
        in_specs=[
            pl.BlockSpec((K1_PAD, block_m), lambda i: (0, i)),     # x^T block
            pl.BlockSpec((H1, K1_PAD), lambda i: (0, 0)),          # w1^T (resident)
            pl.BlockSpec((H1, 1), lambda i: (0, 0)),               # b1
            pl.BlockSpec((H2, H1), lambda i: (0, 0)),              # w2^T
            pl.BlockSpec((H2, 1), lambda i: (0, 0)),               # b2
            pl.BlockSpec((OUT_ROWS_PAD, H2), lambda i: (0, 0)),    # w3^T
            pl.BlockSpec((OUT_ROWS_PAD, 1), lambda i: (0, 0)),     # b3
        ],
        out_specs=pl.BlockSpec((OUT_ROWS_PAD, block_m), lambda i: (0, i)),
        compiler_params=pltpu.CompilerParams(
            dimension_semantics=("parallel",)
        ),
        cost_estimate=pl.CostEstimate(
            flops=flops,
            transcendentals=transcendentals,
            bytes_accessed=bytes_accessed,
        ),
    )(xt, w1t, b1t, w2t, b2t, w3t, b3t)

    # Slice away padding and transpose back outside the kernel (layout plumbing).
    return out_t[:N_ACTIONS, :B].T


def init_params(key):
    """Deterministic init mimicking PyTorch nn.Linear default
    (U(-1/sqrt(fan_in), 1/sqrt(fan_in))). Returns UNPADDED params."""
    def linear(key, fan_in, fan_out):
        kw, kb = jax.random.split(key)
        bound = 1.0 / jnp.sqrt(fan_in)
        w = jax.random.uniform(kw, (fan_in, fan_out), jnp.float32, -bound, bound)
        b = jax.random.uniform(kb, (fan_out,), jnp.float32, -bound, bound)
        return w, b

    k1, k2, k3 = jax.random.split(key, 3)
    w1, b1 = linear(k1, N_STATES, H1)
    w2, b2 = linear(k2, H1, H2)
    w3, b3 = linear(k3, H2, N_ACTIONS)
    return w1, b1, w2, b2, w3, b3


def pad_params(params, compute_dtype=jnp.bfloat16):
    """Transpose + zero-pad weights ONCE into the kernel's layout.

    Layer-1 weight and all biases stay f32 (all VPU/EUP work is f32; layer 1's
    MXU cost is negligible). w2/w3 are stored in `compute_dtype` (bf16 default:
    ~3x MXU throughput on v6e/v7x, f32 accumulation). Pass jnp.float32 for an
    exact path.
    """
    w1, b1, w2, b2, w3, b3 = params
    w1t = jnp.zeros((H1, K1_PAD), jnp.float32).at[:, :N_STATES].set(w1.T)
    b1t = b1.reshape(H1, 1).astype(jnp.float32)
    w2t = w2.T.astype(compute_dtype)                                  # (48, 24)
    b2t = b2.reshape(H2, 1).astype(jnp.float32)
    w3t = jnp.zeros((OUT_ROWS_PAD, H2), jnp.float32).at[:N_ACTIONS, :].set(w3.T)
    w3t = w3t.astype(compute_dtype)                                   # (8, 48)
    b3t = jnp.zeros((OUT_ROWS_PAD, 1), jnp.float32).at[:N_ACTIONS, 0].set(b3)
    return w1t, b1t, w2t, b2t, w3t, b3t


def net_forward_ref(x, params):
    """Pure-JAX reference (unpadded) for correctness checking."""
    w1, b1, w2, b2, w3, b3 = params
    h1 = jnp.tanh(x @ w1 + b1)
    h2 = jnp.tanh(h1 @ w2 + b2)
    return h2 @ w3 + b3


if __name__ == "__main__":
    key = jax.random.PRNGKey(0)
    k_params, k_x = jax.random.split(key)

    params = init_params(k_params)
    padded_f32 = pad_params(params, compute_dtype=jnp.float32)   # exact path
    padded_bf16 = pad_params(params)                             # default bf16 MXU operands

    # 256 rows -> two 128-lane batch tiles -> grid=(2,), so both v7x TCs are used.
    batch = 256
    x = jax.random.normal(k_x, (batch, N_STATES), jnp.float32)
    ref = net_forward_ref(x, params)

    out_f32 = jax.block_until_ready(net_forward(x, padded_f32))
    assert out_f32.shape == (batch, N_ACTIONS)
    assert jnp.allclose(out_f32, ref, atol=1e-5, rtol=1e-5)

    out_bf16 = jax.block_until_ready(net_forward(x, padded_bf16))
    assert out_bf16.shape == (batch, N_ACTIONS)
    assert jnp.allclose(out_bf16, ref, atol=5e-2, rtol=5e-2)

    # Small / non-tile-aligned batch exercises the batch-lane padding path.
    x_small = x[:8]
    out_small = jax.block_until_ready(net_forward(x_small, padded_f32))
    ref_small = net_forward_ref(x_small, params)
    assert out_small.shape == (8, N_ACTIONS)
    assert jnp.allclose(out_small, ref_small, atol=1e-5, rtol=1e-5)

    print("KERNEL_OK")
</pallas_src>

<mosaic_0001>
module attributes {stable_mosaic.version = 11 : i64} {
  func.func @_mlp_kernel(%arg0: i32, %arg1: memref<8x128xf32, #tpu.memory_space<vmem>>, %arg2: memref<24x8xf32, #tpu.memory_space<vmem>>, %arg3: memref<24x1xf32, #tpu.memory_space<vmem>>, %arg4: memref<48x24xf32, #tpu.memory_space<vmem>>, %arg5: memref<48x1xf32, #tpu.memory_space<vmem>>, %arg6: memref<8x48xf32, #tpu.memory_space<vmem>>, %arg7: memref<8x1xf32, #tpu.memory_space<vmem>>, %arg8: memref<8x128xf32, #tpu.memory_space<vmem>>) attributes {dimension_semantics = [#tpu.dimension_semantics<parallel>], iteration_bounds = array<i64: 2>, scalar_prefetch = 0 : i64, scratch_operands = 0 : i64, tpu.core_type = #tpu.core_type<tc>, window_params = [{transform_indices = @transform_0, window_bounds = array<i64: 8, 128>}, {pipeline_mode = #tpu.pipeline_mode<synchronous>, transform_indices = @transform_1, window_bounds = array<i64: 24, 8>}, {pipeline_mode = #tpu.pipeline_mode<synchronous>, transform_indices = @transform_2, window_bounds = array<i64: 24, 1>}, {pipeline_mode = #tpu.pipeline_mode<synchronous>, transform_indices = @transform_3, window_bounds = array<i64: 48, 24>}, {pipeline_mode = #tpu.pipeline_mode<synchronous>, transform_indices = @transform_4, window_bounds = array<i64: 48, 1>}, {pipeline_mode = #tpu.pipeline_mode<synchronous>, transform_indices = @transform_5, window_bounds = array<i64: 8, 48>}, {pipeline_mode = #tpu.pipeline_mode<synchronous>, transform_indices = @transform_6, window_bounds = array<i64: 8, 1>}, {transform_indices = @transform_7, window_bounds = array<i64: 8, 128>}]} {
    %c0 = arith.constant 0 : index
    %c0_0 = arith.constant 0 : index
    %0 = vector.load %arg2[%c0, %c0_0] : memref<24x8xf32, #tpu.memory_space<vmem>>, vector<24x8xf32>
    %c0_1 = arith.constant 0 : index
    %c0_2 = arith.constant 0 : index
    %1 = vector.load %arg1[%c0_1, %c0_2] : memref<8x128xf32, #tpu.memory_space<vmem>>, vector<8x128xf32>
    %cst = arith.constant dense<0.000000e+00> : vector<24x128xf32>
    %2 = tpu.matmul %0, %1, %cst {dimension_numbers = #tpu.dot_dimension_numbers<[1], [0], [0], [1], [0, 0, 1, 1], [], []>} : vector<24x8xf32>, vector<8x128xf32>, vector<24x128xf32> -> vector<24x128xf32>
    %c0_3 = arith.constant 0 : index
    %c0_4 = arith.constant 0 : index
    %3 = vector.load %arg3[%c0_3, %c0_4] : memref<24x1xf32, #tpu.memory_space<vmem>>, vector<24x1xf32>
    %4 = vector.broadcast %3 : vector<24x1xf32> to vector<24x128xf32>
    %5 = arith.addf %2, %4 : vector<24x128xf32>
    %6 = math.tanh %5 : vector<24x128xf32>
    %c0_5 = arith.constant 0 : index
    %c0_6 = arith.constant 0 : index
    %7 = vector.load %arg4[%c0_5, %c0_6] : memref<48x24xf32, #tpu.memory_space<vmem>>, vector<48x24xf32>
    %cst_7 = arith.constant dense<0.000000e+00> : vector<48x128xf32>
    %8 = tpu.matmul %7, %6, %cst_7 {dimension_numbers = #tpu.dot_dimension_numbers<[1], [0], [0], [1], [0, 0, 1, 1], [], []>} : vector<48x24xf32>, vector<24x128xf32>, vector<48x128xf32> -> vector<48x128xf32>
    %c0_8 = arith.constant 0 : index
    %c0_9 = arith.constant 0 : index
    %9 = vector.load %arg5[%c0_8, %c0_9] : memref<48x1xf32, #tpu.memory_space<vmem>>, vector<48x1xf32>
    %10 = vector.broadcast %9 : vector<48x1xf32> to vector<48x128xf32>
    %11 = arith.addf %8, %10 : vector<48x128xf32>
    %12 = math.tanh %11 : vector<48x128xf32>
    %c0_10 = arith.constant 0 : index
    %c0_11 = arith.constant 0 : index
    %13 = vector.load %arg6[%c0_10, %c0_11] : memref<8x48xf32, #tpu.memory_space<vmem>>, vector<8x48xf32>
    %cst_12 = arith.constant dense<0.000000e+00> : vector<8x128xf32>
    %14 = tpu.matmul %13, %12, %cst_12 {dimension_numbers = #tpu.dot_dimension_numbers<[1], [0], [0], [1], [0, 0, 1, 1], [], []>} : vector<8x48xf32>, vector<48x128xf32>, vector<8x128xf32> -> vector<8x128xf32>
    %c0_13 = arith.constant 0 : index
    %c0_14 = arith.constant 0 : index
    %15 = vector.load %arg7[%c0_13, %c0_14] : memref<8x1xf32, #tpu.memory_space<vmem>>, vector<8x1xf32>
    %16 = vector.broadcast %15 : vector<8x1xf32> to vector<8x128xf32>
    %17 = arith.addf %14, %16 : vector<8x128xf32>
    %c0_15 = arith.constant 0 : index
    %c0_16 = arith.constant 0 : index
    %18 = vector.load %arg8[%c0_15, %c0_16] : memref<8x128xf32, #tpu.memory_space<vmem>>, vector<8x128xf32>
    tpu.vector_store %arg8[%c0_15, %c0_16], %17 {strides = array<i32>} : memref<8x128xf32, #tpu.memory_space<vmem>>, vector<8x128xf32>,
    return
  }
  func.func @transform_0(%arg0: i32) -> (i32, i32) {
    %c0_i32 = arith.constant 0 : i32
    %c0_i32_0 = arith.constant 0 : i32
    return %c0_i32, %arg0 : i32, i32
  }
  func.func @transform_1(%arg0: i32) -> (i32, i32) {
    %c0_i32 = arith.constant 0 : i32
    %c0_i32_0 = arith.constant 0 : i32
    %c0_i32_1 = arith.constant 0 : i32
    return %c0_i32, %c0_i32_0 : i32, i32
  }
  func.func @transform_2(%arg0: i32) -> (i32, i32) {
    %c0_i32 = arith.constant 0 : i32
    %c0_i32_0 = arith.constant 0 : i32
    %c0_i32_1 = arith.constant 0 : i32
    return %c0_i32, %c0_i32_0 : i32, i32
  }
  func.func @transform_3(%arg0: i32) -> (i32, i32) {
    %c0_i32 = arith.constant 0 : i32
    %c0_i32_0 = arith.constant 0 : i32
    %c0_i32_1 = arith.constant 0 : i32
    return %c0_i32, %c0_i32_0 : i32, i32
  }
  func.func @transform_4(%arg0: i32) -> (i32, i32) {
    %c0_i32 = arith.constant 0 : i32
    %c0_i32_0 = arith.constant 0 : i32
    %c0_i32_1 = arith.constant 0 : i32
    return %c0_i32, %c0_i32_0 : i32, i32
  }
  func.func @transform_5(%arg0: i32) -> (i32, i32) {
    %c0_i32 = arith.constant 0 : i32
    %c0_i32_0 = arith.constant 0 : i32
    %c0_i32_1 = arith.constant 0 : i32
    return %c0_i32, %c0_i32_0 : i32, i32
  }
  func.func @transform_6(%arg0: i32) -> (i32, i32) {
    %c0_i32 = arith.constant 0 : i32
    %c0_i32_0 = arith.constant 0 : i32
    %c0_i32_1 = arith.constant 0 : i32
    return %c0_i32, %c0_i32_0 : i32, i32
  }
  func.func @transform_7(%arg0: i32) -> (i32, i32) {
    %c0_i32 = arith.constant 0 : i32
    %c0_i32_0 = arith.constant 0 : i32
    return %c0_i32, %arg0 : i32, i32
  }
}

</mosaic_0001>

<bundles_post_ra>
// kernel: net_forward.1
= control target key start
LH: loop header
LB: loop body
LE: loop exit
PB: predicated region body
PF: predicated region fallthrough
CT: control target
= control target key end

     0   :  { %s863_s24 = smov 0   ;;  %s960_s0 = inlined_call_operand.vmem [shape: f32[8,256], index: 0, kind: input, shape index: {}]   ;;  %s961_s1 = inlined_call_operand.vmem [shape: f32[24,8], index: 1, kind: input, shape index: {}]   ;;  %s962_s2 = inlined_call_operand.vmem [shape: f32[24,1], index: 2, kind: input, shape index: {}]   ;;  %s963_s3 = inlined_call_operand.vmem [shape: f32[48,24], index: 3, kind: input, shape index: {}]   ;;  %s964_s4 = inlined_call_operand.vmem [shape: f32[48,1], index: 4, kind: input, shape index: {}]   ;;  %s965_s5 = inlined_call_operand.vmem [shape: f32[8,48], index: 5, kind: input, shape index: {}]   ;;  %s966_s6 = inlined_call_operand.vmem [shape: f32[8,1], index: 6, kind: input, shape index: {}]   ;;  %s967_s7 = inlined_call_operand.vmem [shape: f32[8,256], index: 7, kind: output, shape index: {}]  }
   0x1 LB: > { %s686_s25 = sadd.s32 4294967295, %s817_s24   ;;  %p690_p0 = scmp.ge.s32.totalorder %s817_s24, 1  ;;  %s817_s24 = sphi %s863_s24, %s17_s24  }
   0x2   : > { %p236_p1 = scmp.lt.s32.totalorder %s817_s24, 3 }
   0x4   : > { %p237_p2 = pnand %p690_p0, %p236_p1 }
   0x5   : > { %p266_p3 = scmp.lt.s32.totalorder (!%p237_p2), %s686_s25, 1  ;;  %v819_v0 = vmov (!%p237_p2), 0.0   ;;  %vm820_vm0 = vmmov (!%p237_p2), 0   ;;  %v278_v1 = vld [vmem:[%s962_s2] sm:$0xff] (!%p237_p2)  ;;  %v821_v2 = vmov (!%p237_p2), 0   ;;  %v280_v3 = vld [vmem:[%s962_s2 + $0x10] sm:$0xff] (!%p237_p2) }
   0x6   : > { %240 = sbr.rel (%p237_p2) target bundleno = 709 (0x2c5), region = 48  ;;  %725 = vmatprep.subr.mxu0 (!%p237_p2), %v819_v0  ;;  %727 = vmatprep.mubr.msk.f32.mxu0 (!%p237_p2), %vm820_vm0, %v819_v0  ;;  %v279_v4 = vld [vmem:[%s962_s2 + $0x8] sm:$0xff] (!%p237_p2)  ;;  %v274_v5 = vld [vmem:[%s961_s1] sm:$0xff] (!%p237_p2)  ;;  %vm296_vm1 = vcmask (!%p237_p2), 64512   ;;  %v397_v10 = vld [vmem:[%s964_s4 + $0x10] sm:$0xff] (!%p237_p2)  ;;  %vm431_vm2 = vcmask (!%p237_p2), 195584  }
   0x7   : > { %791 = vset.pattern.permute.xlu0 (!%p237_p2), %v821_v2  ;;  %792 = vset.pattern.permute.xlu1 (!%p237_p2), %v821_v2  ;;  %v395_v6 = vld [vmem:[%s964_s4] sm:$0xff] (!%p237_p2)  ;;  %v396_v8 = vld [vmem:[%s964_s4 + $0x8] sm:$0xff] (!%p237_p2)  ;;  %v398_v11 = vld [vmem:[%s964_s4 + $0x18] sm:$0xff] (!%p237_p2)  ;;  %v822_v38 = vmov (!%p237_p2), 0.0|0.0   ;;  %vm558_vm3 = vcmask (!%p237_p2), 392192  }
   0x8   : > { %283 = vperm.xlu0 (!%p237_p2), %791, %v278_v1   ;;  %293 = vperm.xlu1 (!%p237_p2), %792, %v280_v3   ;;  %v275_v9 = vld [vmem:[%s961_s1 + $0x8] sm:$0xff] (!%p237_p2)  ;;  %v276_v12 = vld [vmem:[%s961_s1 + $0x10] sm:$0xff] (!%p237_p2)  ;;  %v399_v13 = vld [vmem:[%s964_s4 + $0x20] sm:$0xff] (!%p237_p2) }
   0x9   : > { %v400_v14 = vld [vmem:[%s964_s4 + $0x28] sm:$0xff] (!%p237_p2)  ;;  %v552_v15 = vld [vmem:[%s966_s6] sm:$0xff] (!%p237_p2)  ;;  %v391_v34 = vld [vmem:[%s963_s3 + $0x10] sm:$0xff] (!%p237_p2) }
   0xa   : > { %v389_v16 = vld [vmem:[%s963_s3] sm:$0xff] (!%p237_p2)  ;;  %v390_v33 = vld [vmem:[%s963_s3 + $0x8] sm:$0xff] (!%p237_p2)  ;;  %v392_v35 = vld [vmem:[%s963_s3 + $0x18] sm:$0xff] (!%p237_p2) }
   0xb   : > { %742 = vmatprep.mubr.msk.f32.mxu1 (!%p237_p2), %vm431_vm2, %v389_v16  ;;  %v393_v36 = vld [vmem:[%s963_s3 + $0x20] sm:$0xff] (!%p237_p2)  ;;  %v394_v37 = vld [vmem:[%s963_s3 + $0x28] sm:$0xff] (!%p237_p2) }
   0xc   : > { %288 = vperm.xlu0 (!%p237_p2), %791, %v279_v4   ;;  %403 = vperm.xlu1 (!%p237_p2), %792, %v395_v6   ;;  %v551_v2 = vld [vmem:[%s965_s5] sm:$0xff] (!%p237_p2) }
   0xd   : > { %s969_s25 = smov (!%p266_p3, %s686_s25), 1 }
   0xe   : > { %s691_s30 = sshll.u32 %s969_s25, 3 }
   0xf   : > { %s269_s12 = scalar_lea.vmem %s960_s0, %s691_s30  ;;  %s273_s9 = scalar_lea.vmem %s967_s7, %s691_s30 }
  0x10   : > { %v277_v7 = vld [vmem:[%s269_s12] sm:$0xff]  ;;  %408 = vperm.xlu0 %791, %v396_v8   ;;  %413 = vperm.xlu1 %792, %v397_v10  }
  0x11   : > { %726 = vmatpush3.msra.mxu0 %v277_v7 }
  0x12   : > { %728 = vmatmul.mubr.msk.f32.vlgmr.msra.gmra.mrb[0].mxu0 %vm296_vm1, %v274_v5  ;;  %770 = vmatprep.subr.bf16.mxu0 %v822_v38 }
  0x13   : > { %730 = vmatprep.mubr.msk.f32.mxu0 %vm820_vm0, %v819_v0 }
  0x14   : > { %418 = vperm.xlu0 %791, %v398_v11   ;;  %423 = vperm.xlu1 %792, %v399_v13  }
  0x16   : > { %731 = vmatmul.mubr.msk.f32.gmra.mrb[2].mxu0 %vm296_vm1, %v275_v9 }
  0x17   : > { %733 = vmatprep.mubr.msk.f32.mxu0 %vm820_vm0, %v819_v0 }
  0x18   : > { %428 = vperm.xlu0 %791, %v400_v14   ;;  %555 = vperm.xlu1 %792, %v552_v15  }
  0x1a   : > { %734 = vmatmul.mubr.msk.f32.gmra.mrb[4].mxu0 %vm296_vm1, %v276_v12 }
  0x1b   : > { %763 = vmatprep.mubr.msk.f32.mxu0 %vm820_vm0, %v819_v0 }
  0x87   : > { %v284_v17 = vpop.permute.xlu0 %283  ;;  %v294_v25 = vpop.permute.xlu1 %293 }
  0x8b   : > { %v289_v21 = vpop.permute.xlu0 %288  ;;  %v404_v40 = vpop.permute.xlu1 %403 }
  0x8f   : > { %v409_v39 = vpop.permute.xlu0 %408  ;;  %v414_v46 = vpop.permute.xlu1 %413 }
  0x93   : > { %v419_v44 = vpop.permute.xlu0 %418  ;;  %v424_v53 = vpop.permute.xlu1 %423 }
  0x97   : > { %v429_v51 = vpop.permute.xlu0 %428  ;;  %v556_v3 = vpop.permute.xlu1 %555 }
  0xe5   : > { %v372_v18 = vpop.f32.mrb[0].mxu0 }
  0xe6   : > { %v729_v19 = vpop.f32.mrb[1].mxu0  ;;  %v373_v20 = vadd.f32 %v372_v18, %v284_v17 }
  0xe8   : > { %793 = vtanh.f32 %v373_v20 }
  0xe9   : > { %v377_v22 = vpop.f32.mrb[2].mxu0 }
  0xea   : > { %v378_v23 = vadd.f32 %v377_v22, %v289_v21  ;;  %v732_v24 = vpop.f32.mrb[3].mxu0 }
  0xec   : > { %795 = vtanh.f32 %v378_v23 }
  0xed   : > { %v382_v26 = vpop.f32.mrb[4].mxu0 }
  0xee   : > { %v383_v27 = vadd.f32 %v382_v26, %v294_v25  ;;  %v735_v28 = vpop.f32.mrb[5].mxu0 }
  0xf0   : > { %797 = vtanh.f32 %v383_v27 }
  0xf2   : > { %v794_v29 = vpop.eup %793 }
  0xf6   : > { %v796_v30 = vpop.eup %795 }
  0xf7   : > { %v766_v31 = vpack.c.bf16 %v796_v30, %v794_v29 }
  0xf9   : > { %767 = vmatprep.subr.bf16.mxu1 %v766_v31 }
  0xfa   : > { %v798_v32 = vpop.eup %797  ;;  %769 = vmatpush3.bf16.msra.mxu1 %v766_v31 }
  0xfb   : > { %740 = vmatprep.subr.mxu1 %v798_v32 }
  0xfe   : > { %741 = vmatpush3.msra.mxu1 %v798_v32 }
  0xff   : > { %743 = vmatmul.mubr.msk.f32.vlgmr.msra.gmra.mrb[0].mxu1 %vm431_vm2, %v390_v33 }
 0x100   : > { %745 = vmatprep.mubr.msk.f32.mxu1 %vm431_vm2, %v391_v34 }
 0x103   : > { %746 = vmatmul.mubr.msk.f32.gmra.mrb[2].mxu1 %vm431_vm2, %v392_v35 }
 0x104   : > { %748 = vmatprep.mubr.msk.f32.mxu1 %vm431_vm2, %v393_v36 }
 0x107   : > { %749 = vmatmul.mubr.msk.f32.gmra.mrb[4].mxu1 %vm431_vm2, %v394_v37 }
 0x1d2   : > { %v744_v41 = vpop.f32.mrb[0].mxu1 }
 0x1d3   : > { %v522_v42 = vadd.f32 %v744_v41, %v409_v39  ;;  %v516_v43 = vpop.f32.mrb[1].mxu1 }
 0x1d4   : > { %v517_v45 = vadd.f32 %v516_v43, %v404_v40 }
 0x1d5   : > { %799 = vtanh.f32 %v522_v42 }
 0x1d6   : > { %801 = vtanh.f32 %v517_v45  ;;  %v747_v47 = vpop.f32.mrb[2].mxu1 }
 0x1d7   : > { %v532_v48 = vadd.f32 %v747_v47, %v419_v44  ;;  %v526_v49 = vpop.f32.mrb[3].mxu1 }
 0x1d8   : > { %v527_v50 = vadd.f32 %v526_v49, %v414_v46 }
 0x1d9   : > { %803 = vtanh.f32 %v532_v48 }
 0x1da   : > { %805 = vtanh.f32 %v527_v50  ;;  %v750_v52 = vpop.f32.mrb[4].mxu1 }
 0x1db   : > { %v542_v54 = vadd.f32 %v750_v52, %v429_v51  ;;  %v536_v55 = vpop.f32.mrb[5].mxu1 }
 0x1dc   : > { %v537_v56 = vadd.f32 %v536_v55, %v424_v53 }
 0x1dd   : > { %807 = vtanh.f32 %v542_v54 }
 0x1de   : > { %809 = vtanh.f32 %v537_v56 }
 0x1df   : > { %v800_v57 = vpop.eup %799 }
 0x1e0   : > { %v802_v58 = vpop.eup %801 }
 0x1e1   : > { %v771_v59 = vpack.c.bf16 %v800_v57, %v802_v58 }
 0x1e3   : > { %v804_v60 = vpop.eup %803  ;;  %772 = vmatpush3.bf16.msra.mxu0 %v771_v59 }
 0x1e4   : > { %v806_v61 = vpop.eup %805  ;;  %773 = vmatprep.subr.bf16.mxu0 %v822_v38 }
 0x1e5   : > { %v774_v62 = vpack.c.bf16 %v804_v60, %v806_v61 }
 0x1e7   : > { %v808_v63 = vpop.eup %807  ;;  %775 = vmatpush3.bf16.msra.mxu0 %v774_v62 }
 0x1e8   : > { %v810_v0 = vpop.eup %809  ;;  %776 = vmatprep.subr.bf16.mxu0 %v822_v38 }
 0x1e9   : > { %v777_v1 = vpack.c.bf16 %v808_v63, %v810_v0 }
 0x1eb   : > { %778 = vmatpush3.bf16.msra.mxu0 %v777_v1 }
 0x1ee   : > { %764 = vmatmul.mubr.msk.f32.vlgmr.msra.gmra.mrb[6].mxu0 %vm558_vm3, %v551_v2 }
 0x2c1   : > { %v628_v4 = vpop.f32.mrb[6].mxu0 }
 0x2c2   : > { %v629_v5 = vadd.f32 %v628_v4, %v556_v3  ;;  %v765_v6 = vpop.f32.mrb[7].mxu0 }
 0x2c4   : > { %632 = vst [vmem:[%s273_s9] sm:$0xff] %v629_v5 }
 0x2c5 PF: > { %s17_s24 = sadd.s32 1, %s817_s24  }
 0x2c6   : > { %p14_p4 = scmp.ge.s32.totalorder %s17_s24, 4  }
 0x2c8   :  { %16 = sbr.rel (!%p14_p4) target bundleno = 1 (0x1), region = 78 }

</bundles_post_ra>
